<compile_context>
chip_gen: v7x
topology: tpu7x:2x2x1
jax: 0.10.0
libtpu: 0.0.40
codegen_flags: <defaults>
</compile_context>

<pallas_src>
from typing import NamedTuple

import jax
import jax.numpy as jnp
from jax.experimental import pallas as pl
from jax.experimental.pallas import tpu as pltpu

# Hidden sizes from the PyTorch module.
HIDDEN = (32, 64, 128, 256, 64)
LANE = 128


def _round_up(n, m):
    return ((n + m - 1) // m) * m


def _cdiv(a, b):
    return (a + b - 1) // b


class PreparedDQN(NamedTuple):
    """Parameters prepared once (offline) and reused by every forward call."""
    weights: tuple           # 6 arrays (in_dim, out_dim) in compute dtype; last lane-padded
    bias_buf: jnp.ndarray    # (8, >=256) f32; row l = bias of layer l, zero-padded
    n_actions: int           # true (unpadded) number of actions


def init_dqn_params(key, obs_dim, n_actions, dtype=jnp.float32):
    """PyTorch nn.Linear-style init: U(-1/sqrt(fan_in), 1/sqrt(fan_in))."""
    dims = (obs_dim,) + HIDDEN + (n_actions,)
    params = []
    for i in range(len(dims) - 1):
        fan_in, fan_out = dims[i], dims[i + 1]
        key, kw, kb = jax.random.split(key, 3)
        bound = 1.0 / jnp.sqrt(jnp.float32(fan_in))
        # stored as (in, out) == PyTorch weight (out, in) transposed
        w = jax.random.uniform(kw, (fan_in, fan_out), dtype, -bound, bound)
        b = jax.random.uniform(kb, (1, fan_out), dtype, -bound, bound)
        params.append((w, b))
    return params


def prepare_params(params, compute_dtype=jnp.float32):
    """One-time parameter preparation (do NOT call per forward).

    * Weights cast to `compute_dtype` (MXU operand dtype).  bf16 is fine on all
      of v5e/v6e/v7x because bias-add / ReLU / accumulation stay f32 in-kernel.
    * Final layer zero-padded to a lane-dense width NP (multiple of 128) so the
      kernel's epilogue store is unmasked.
    * The six biases are stacked into a single (8, >=256) f32 buffer so the
      kernel needs one bias DMA instead of six.
    """
    n_actions = params[-1][0].shape[1]
    NP = _round_up(max(n_actions, LANE), LANE)
    bias_lanes = max(256, NP)

    weights = []
    bias_buf = jnp.zeros((8, bias_lanes), jnp.float32)
    for l, (w, b) in enumerate(params):
        w = w.astype(compute_dtype)
        if l == len(params) - 1 and NP != n_actions:
            w = jnp.pad(w, ((0, 0), (0, NP - n_actions)))
        weights.append(w)
        bias_buf = bias_buf.at[l, : b.shape[-1]].set(
            b.reshape(-1).astype(jnp.float32))
    return PreparedDQN(tuple(weights), bias_buf, n_actions)


def _make_dqn_kernel(compute_dtype, out_dims):
    """Fused 6-layer MLP kernel for a given MXU operand dtype."""
    n_layers = len(out_dims)

    def kernel(x_ref, *refs):
        w_refs = refs[:n_layers]
        b_ref = refs[n_layers]          # (8, >=256) f32, VMEM-resident
        o_ref = refs[n_layers + 1]

        h = x_ref[...]                  # already compute_dtype (cast in wrapper)
        for l in range(n_layers):
            n = out_dims[l]
            # MXU matmul with f32 accumulation; bias (static slice of the
            # resident bias buffer) + ReLU stay f32 on the VPU.
            y = jnp.dot(h, w_refs[l][...], preferred_element_type=jnp.float32)
            y = y + b_ref[l:l + 1, 0:n]
            if l < n_layers - 1:
                h = jnp.maximum(y, 0.0).astype(compute_dtype)
            else:
                # Final layer: no ReLU (Q-values); lane-dense unmasked store.
                o_ref[...] = y.astype(o_ref.dtype)

    return kernel


def _pick_tm(B, tm, sublane, tm_max=512, align=256):
    """Padding-aware batch-tile choice (multiple of `sublane`)."""
    if tm is None:
        # Fewest grid steps of <= tm_max rows, each a multiple of `align`
        # (256 keeps the MXU M-stream long on v6e/v7x; 128 suffices on v5e).
        n_tiles = max(1, _cdiv(B, tm_max))
        tm = _round_up(_cdiv(B, n_tiles), align)
    tm = _round_up(max(tm, sublane), sublane)
    # Never pad a small batch out to a full tile: cap at round_up(B, sublane).
    return max(sublane, min(tm, _round_up(B, sublane)))


def dqn_forward(x, prepared, *, tm=None, tm_max=512, align=256):
    """Fused DQN forward pass.

    x:        (B, obs_dim) activations (any float dtype).
    prepared: PreparedDQN from prepare_params() (one-time).
    tm:       optional batch-tile override (rounded up to a legal sublane
              multiple).  Default: padding-aware choice of at most tm_max rows.
              On v7x with large B, pass tm ~= round_up(cdiv(B, 2), 256) so the
              grid has >= 2 steps and both TensorCores get work.
    """
    weights, bias_buf, n_actions = prepared
    compute_dtype = weights[0].dtype
    B, obs_dim = x.shape
    assert obs_dim == weights[0].shape[0], "obs_dim mismatch with prepared params"
    NP = weights[-1].shape[1]
    out_dims = tuple(w.shape[1] for w in weights)

    # Sublane multiple required by the activation dtype: (8,128) f32 tiles,
    # (16,128) bf16 tiles.
    itemsize = jnp.dtype(compute_dtype).itemsize
    sublane = 8 * (4 // itemsize)
    TM = _pick_tm(B, tm, sublane, tm_max=tm_max, align=align)
    B_pad = _round_up(B, TM)

    # Per-call activation prep only; all parameter prep was hoisted offline.
    x_p = x.astype(compute_dtype)
    if B_pad != B:
        x_p = jnp.pad(x_p, ((0, B_pad - B), (0, 0)))

    grid = (B_pad // TM,)

    # Weights / stacked biases: full-shape blocks with constant index_map ->
    # DMA'd once, VMEM-resident for all batch tiles.  They never change across
    # grid steps, so single-buffer them (no double-buffer VMEM/bookkeeping).
    def const_spec(a):
        return pl.BlockSpec(a.shape, lambda i: (0, 0),
                            pipeline_mode=pl.Buffered(1))

    in_specs = ([pl.BlockSpec((TM, obs_dim), lambda i: (i, 0))]
                + [const_spec(w) for w in weights]
                + [const_spec(bias_buf)])
    out_specs = pl.BlockSpec((TM, NP), lambda i: (i, 0))   # lane-dense output

    flops = 2 * B_pad * sum(w.shape[0] * w.shape[1] for w in weights)
    bytes_accessed = (B_pad * obs_dim * itemsize
                      + sum(w.size * itemsize for w in weights)
                      + bias_buf.size * 4
                      + B_pad * NP * 4)

    out = pl.pallas_call(
        _make_dqn_kernel(compute_dtype, out_dims),
        out_shape=jax.ShapeDtypeStruct((B_pad, NP), jnp.float32),
        grid=grid,
        in_specs=in_specs,
        out_specs=out_specs,
        compiler_params=pltpu.CompilerParams(
            dimension_semantics=("parallel",)),            # megacore split on v7x
        cost_estimate=pl.CostEstimate(flops=flops, transcendentals=0,
                                      bytes_accessed=bytes_accessed),
    )(x_p, *weights, bias_buf)

    return out[:B, :n_actions]


def dqn_reference(x, params):
    """Pure-JAX reference of the same math (f32)."""
    h = x
    for i, (w, b) in enumerate(params):
        h = h @ w + b
        if i < len(params) - 1:
            h = jnp.maximum(h, 0.0)
    return h


if __name__ == "__main__":
    key = jax.random.PRNGKey(0)
    k_params, k_x1, k_x2 = jax.random.split(key, 3)

    obs_dim = 8        # observation_space
    n_actions = 4      # action_space.n
    params = init_dqn_params(k_params, obs_dim, n_actions)

    # One-time parameter preparation (hoisted out of the forward path).
    prep_f32 = prepare_params(params, compute_dtype=jnp.float32)
    prep_bf16 = prepare_params(params, compute_dtype=jnp.bfloat16)

    # --- tiny per-env-step batch (single 8-row tile) --------------------------
    x_small = jax.random.normal(k_x1, (2, obs_dim), jnp.float32)
    q_small = dqn_forward(x_small, prep_f32)
    jax.block_until_ready(q_small)
    ref_small = dqn_reference(x_small, params)
    assert q_small.shape == (2, n_actions)
    assert jnp.allclose(q_small, ref_small, atol=1e-5, rtol=1e-5)

    # --- replay-buffer batch: padding-aware default tile (300 -> one 304-row tile)
    x_big = jax.random.normal(k_x2, (300, obs_dim), jnp.float32)
    q_big = dqn_forward(x_big, prep_f32)
    jax.block_until_ready(q_big)
    ref_big = dqn_reference(x_big, params)
    assert q_big.shape == (300, n_actions)
    assert jnp.allclose(q_big, ref_big, atol=1e-4, rtol=1e-4)

    # --- explicit (awkward) tm override: rounded up to a legal sublane multiple,
    #     multi-step grid exercising the auto double-buffered batch pipeline.
    q_tm = dqn_forward(x_big, prep_f32, tm=100)    # -> TM=104, grid of 3 tiles
    jax.block_until_ready(q_tm)
    assert jnp.allclose(q_tm, ref_big, atol=1e-4, rtol=1e-4)

    # --- bf16 MXU-operand path (valid on v5e/v6e/v7x; f32 accumulation) -------
    q_bf16 = dqn_forward(x_big, prep_bf16)
    jax.block_until_ready(q_bf16)
    assert q_bf16.shape == (300, n_actions)
    assert bool(jnp.all(jnp.isfinite(q_bf16)))
    assert jnp.allclose(q_bf16, ref_big, atol=1e-1, rtol=1e-1)

    print("KERNEL_OK")
</pallas_src>

<mosaic_0001>
module attributes {stable_mosaic.version = 11 : i64} {
  func.func @kernel(%arg0: i32, %arg1: memref<8x8xf32, #tpu.memory_space<vmem>>, %arg2: memref<8x32xf32, #tpu.memory_space<vmem>>, %arg3: memref<32x64xf32, #tpu.memory_space<vmem>>, %arg4: memref<64x128xf32, #tpu.memory_space<vmem>>, %arg5: memref<128x256xf32, #tpu.memory_space<vmem>>, %arg6: memref<256x64xf32, #tpu.memory_space<vmem>>, %arg7: memref<64x128xf32, #tpu.memory_space<vmem>>, %arg8: memref<8x256xf32, #tpu.memory_space<vmem>>, %arg9: memref<8x128xf32, #tpu.memory_space<vmem>>) attributes {dimension_semantics = [#tpu.dimension_semantics<parallel>], iteration_bounds = array<i64: 1>, scalar_prefetch = 0 : i64, scratch_operands = 0 : i64, tpu.core_type = #tpu.core_type<tc>, window_params = [{transform_indices = @transform_0, window_bounds = array<i64: 8, 8>}, {pipeline_mode = #tpu.pipeline_mode<synchronous>, transform_indices = @transform_1, window_bounds = array<i64: 8, 32>}, {pipeline_mode = #tpu.pipeline_mode<synchronous>, transform_indices = @transform_2, window_bounds = array<i64: 32, 64>}, {pipeline_mode = #tpu.pipeline_mode<synchronous>, transform_indices = @transform_3, window_bounds = array<i64: 64, 128>}, {pipeline_mode = #tpu.pipeline_mode<synchronous>, transform_indices = @transform_4, window_bounds = array<i64: 128, 256>}, {pipeline_mode = #tpu.pipeline_mode<synchronous>, transform_indices = @transform_5, window_bounds = array<i64: 256, 64>}, {pipeline_mode = #tpu.pipeline_mode<synchronous>, transform_indices = @transform_6, window_bounds = array<i64: 64, 128>}, {pipeline_mode = #tpu.pipeline_mode<synchronous>, transform_indices = @transform_7, window_bounds = array<i64: 8, 256>}, {transform_indices = @transform_8, window_bounds = array<i64: 8, 128>}]} {
    %c0 = arith.constant 0 : index
    %c0_0 = arith.constant 0 : index
    %0 = vector.load %arg1[%c0, %c0_0] : memref<8x8xf32, #tpu.memory_space<vmem>>, vector<8x8xf32>
    %c0_1 = arith.constant 0 : index
    %c0_2 = arith.constant 0 : index
    %1 = vector.load %arg2[%c0_1, %c0_2] : memref<8x32xf32, #tpu.memory_space<vmem>>, vector<8x32xf32>
    %cst = arith.constant dense<0.000000e+00> : vector<8x32xf32>
    %2 = tpu.matmul %0, %1, %cst {dimension_numbers = #tpu.dot_dimension_numbers<[1], [0], [0], [1], [0, 0, 1, 1], [], []>} : vector<8x8xf32>, vector<8x32xf32>, vector<8x32xf32> -> vector<8x32xf32>
    %c0_3 = arith.constant 0 : index
    %c0_4 = arith.constant 0 : index
    %3 = vector.load %arg8[%c0_3, %c0_4] : memref<8x256xf32, #tpu.memory_space<vmem>>, vector<1x32xf32>
    %4 = vector.broadcast %3 : vector<1x32xf32> to vector<8x32xf32>
    %5 = arith.addf %2, %4 : vector<8x32xf32>
    %cst_5 = arith.constant 0.000000e+00 : f32
    %6 = vector.broadcast %cst_5 : f32 to vector<8x32xf32>
    %7 = arith.maximumf %5, %6 : vector<8x32xf32>
    %c0_6 = arith.constant 0 : index
    %c0_7 = arith.constant 0 : index
    %8 = vector.load %arg3[%c0_6, %c0_7] : memref<32x64xf32, #tpu.memory_space<vmem>>, vector<32x64xf32>
    %cst_8 = arith.constant dense<0.000000e+00> : vector<8x64xf32>
    %9 = tpu.matmul %7, %8, %cst_8 {dimension_numbers = #tpu.dot_dimension_numbers<[1], [0], [0], [1], [0, 0, 1, 1], [], []>} : vector<8x32xf32>, vector<32x64xf32>, vector<8x64xf32> -> vector<8x64xf32>
    %c1 = arith.constant 1 : index
    %c0_9 = arith.constant 0 : index
    %10 = vector.load %arg8[%c1, %c0_9] : memref<8x256xf32, #tpu.memory_space<vmem>>, vector<1x64xf32>
    %11 = vector.broadcast %10 : vector<1x64xf32> to vector<8x64xf32>
    %12 = arith.addf %9, %11 : vector<8x64xf32>
    %cst_10 = arith.constant 0.000000e+00 : f32
    %13 = vector.broadcast %cst_10 : f32 to vector<8x64xf32>
    %14 = arith.maximumf %12, %13 : vector<8x64xf32>
    %c0_11 = arith.constant 0 : index
    %c0_12 = arith.constant 0 : index
    %15 = vector.load %arg4[%c0_11, %c0_12] : memref<64x128xf32, #tpu.memory_space<vmem>>, vector<64x128xf32>
    %cst_13 = arith.constant dense<0.000000e+00> : vector<8x128xf32>
    %16 = tpu.matmul %14, %15, %cst_13 {dimension_numbers = #tpu.dot_dimension_numbers<[1], [0], [0], [1], [0, 0, 1, 1], [], []>} : vector<8x64xf32>, vector<64x128xf32>, vector<8x128xf32> -> vector<8x128xf32>
    %c2 = arith.constant 2 : index
    %c0_14 = arith.constant 0 : index
    %17 = vector.load %arg8[%c2, %c0_14] : memref<8x256xf32, #tpu.memory_space<vmem>>, vector<1x128xf32>
    %18 = vector.broadcast %17 : vector<1x128xf32> to vector<8x128xf32>
    %19 = arith.addf %16, %18 : vector<8x128xf32>
    %cst_15 = arith.constant 0.000000e+00 : f32
    %20 = vector.broadcast %cst_15 : f32 to vector<8x128xf32>
    %21 = arith.maximumf %19, %20 : vector<8x128xf32>
    %c0_16 = arith.constant 0 : index
    %c0_17 = arith.constant 0 : index
    %22 = vector.load %arg5[%c0_16, %c0_17] : memref<128x256xf32, #tpu.memory_space<vmem>>, vector<128x256xf32>
    %cst_18 = arith.constant dense<0.000000e+00> : vector<8x256xf32>
    %23 = tpu.matmul %21, %22, %cst_18 {dimension_numbers = #tpu.dot_dimension_numbers<[1], [0], [0], [1], [0, 0, 1, 1], [], []>} : vector<8x128xf32>, vector<128x256xf32>, vector<8x256xf32> -> vector<8x256xf32>
    %c3 = arith.constant 3 : index
    %c0_19 = arith.constant 0 : index
    %24 = vector.load %arg8[%c3, %c0_19] : memref<8x256xf32, #tpu.memory_space<vmem>>, vector<1x256xf32>
    %25 = vector.broadcast %24 : vector<1x256xf32> to vector<8x256xf32>
    %26 = arith.addf %23, %25 : vector<8x256xf32>
    %cst_20 = arith.constant 0.000000e+00 : f32
    %27 = vector.broadcast %cst_20 : f32 to vector<8x256xf32>
    %28 = arith.maximumf %26, %27 : vector<8x256xf32>
    %c0_21 = arith.constant 0 : index
    %c0_22 = arith.constant 0 : index
    %29 = vector.load %arg6[%c0_21, %c0_22] : memref<256x64xf32, #tpu.memory_space<vmem>>, vector<256x64xf32>
    %cst_23 = arith.constant dense<0.000000e+00> : vector<8x64xf32>
    %30 = tpu.matmul %28, %29, %cst_23 {dimension_numbers = #tpu.dot_dimension_numbers<[1], [0], [0], [1], [0, 0, 1, 1], [], []>} : vector<8x256xf32>, vector<256x64xf32>, vector<8x64xf32> -> vector<8x64xf32>
    %c4 = arith.constant 4 : index
    %c0_24 = arith.constant 0 : index
    %31 = vector.load %arg8[%c4, %c0_24] : memref<8x256xf32, #tpu.memory_space<vmem>>, vector<1x64xf32>
    %32 = vector.broadcast %31 : vector<1x64xf32> to vector<8x64xf32>
    %33 = arith.addf %30, %32 : vector<8x64xf32>
    %cst_25 = arith.constant 0.000000e+00 : f32
    %34 = vector.broadcast %cst_25 : f32 to vector<8x64xf32>
    %35 = arith.maximumf %33, %34 : vector<8x64xf32>
    %c0_26 = arith.constant 0 : index
    %c0_27 = arith.constant 0 : index
    %36 = vector.load %arg7[%c0_26, %c0_27] : memref<64x128xf32, #tpu.memory_space<vmem>>, vector<64x128xf32>
    %cst_28 = arith.constant dense<0.000000e+00> : vector<8x128xf32>
    %37 = tpu.matmul %35, %36, %cst_28 {dimension_numbers = #tpu.dot_dimension_numbers<[1], [0], [0], [1], [0, 0, 1, 1], [], []>} : vector<8x64xf32>, vector<64x128xf32>, vector<8x128xf32> -> vector<8x128xf32>
    %c5 = arith.constant 5 : index
    %c0_29 = arith.constant 0 : index
    %38 = vector.load %arg8[%c5, %c0_29] : memref<8x256xf32, #tpu.memory_space<vmem>>, vector<1x128xf32>
    %39 = vector.broadcast %38 : vector<1x128xf32> to vector<8x128xf32>
    %40 = arith.addf %37, %39 : vector<8x128xf32>
    %c0_30 = arith.constant 0 : index
    %c0_31 = arith.constant 0 : index
    %41 = vector.load %arg9[%c0_30, %c0_31] : memref<8x128xf32, #tpu.memory_space<vmem>>, vector<8x128xf32>
    tpu.vector_store %arg9[%c0_30, %c0_31], %40 {strides = array<i32>} : memref<8x128xf32, #tpu.memory_space<vmem>>, vector<8x128xf32>,
    return
  }
  func.func @transform_0(%arg0: i32) -> (i32, i32) {
    %c0_i32 = arith.constant 0 : i32
    %c0_i32_0 = arith.constant 0 : i32
    return %arg0, %c0_i32 : i32, i32
  }
  func.func @transform_1(%arg0: i32) -> (i32, i32) {
    %c0_i32 = arith.constant 0 : i32
    %c0_i32_0 = arith.constant 0 : i32
    %c0_i32_1 = arith.constant 0 : i32
    return %c0_i32, %c0_i32_0 : i32, i32
  }
  func.func @transform_2(%arg0: i32) -> (i32, i32) {
    %c0_i32 = arith.constant 0 : i32
    %c0_i32_0 = arith.constant 0 : i32
    %c0_i32_1 = arith.constant 0 : i32
    return %c0_i32, %c0_i32_0 : i32, i32
  }
  func.func @transform_3(%arg0: i32) -> (i32, i32) {
    %c0_i32 = arith.constant 0 : i32
    %c0_i32_0 = arith.constant 0 : i32
    %c0_i32_1 = arith.constant 0 : i32
    return %c0_i32, %c0_i32_0 : i32, i32
  }
  func.func @transform_4(%arg0: i32) -> (i32, i32) {
    %c0_i32 = arith.constant 0 : i32
    %c0_i32_0 = arith.constant 0 : i32
    %c0_i32_1 = arith.constant 0 : i32
    return %c0_i32, %c0_i32_0 : i32, i32
  }
  func.func @transform_5(%arg0: i32) -> (i32, i32) {
    %c0_i32 = arith.constant 0 : i32
    %c0_i32_0 = arith.constant 0 : i32
    %c0_i32_1 = arith.constant 0 : i32
    return %c0_i32, %c0_i32_0 : i32, i32
  }
  func.func @transform_6(%arg0: i32) -> (i32, i32) {
    %c0_i32 = arith.constant 0 : i32
    %c0_i32_0 = arith.constant 0 : i32
    %c0_i32_1 = arith.constant 0 : i32
    return %c0_i32, %c0_i32_0 : i32, i32
  }
  func.func @transform_7(%arg0: i32) -> (i32, i32) {
    %c0_i32 = arith.constant 0 : i32
    %c0_i32_0 = arith.constant 0 : i32
    %c0_i32_1 = arith.constant 0 : i32
    return %c0_i32, %c0_i32_0 : i32, i32
  }
  func.func @transform_8(%arg0: i32) -> (i32, i32) {
    %c0_i32 = arith.constant 0 : i32
    %c0_i32_0 = arith.constant 0 : i32
    return %arg0, %c0_i32 : i32, i32
  }
}

</mosaic_0001>

<bundles_post_ra>
// kernel: tpu_custom_call.1
= control target key start
LH: loop header
LB: loop body
LE: loop exit
PB: predicated region body
PF: predicated region fallthrough
CT: control target
= control target key end

     0   :  { %13 = vsyncpa [#allocation3], 0  ;;  %s1328_s0 = inlined_call_operand.hbm [shape: f32[8,8], index: 0, kind: input, shape index: {}]   ;;  %s1329_s1 = inlined_call_operand.hbm [shape: f32[8,32], index: 1, kind: input, shape index: {}]   ;;  %s1330_s2 = inlined_call_operand.hbm [shape: f32[32,64], index: 2, kind: input, shape index: {}]   ;;  %s1331_s3 = inlined_call_operand.vmem [shape: f32[64,128], index: 3, kind: input, shape index: {}]   ;;  %s1332_s4 = inlined_call_operand.vmem [shape: f32[128,256], index: 4, kind: input, shape index: {}]   ;;  %s1333_s5 = inlined_call_operand.vmem [shape: f32[256,64], index: 5, kind: input, shape index: {}]   ;;  %s1334_s6 = inlined_call_operand.vmem [shape: f32[64,128], index: 6, kind: input, shape index: {}]   ;;  %s1335_s7 = inlined_call_operand.vmem [shape: f32[8,256], index: 7, kind: input, shape index: {}]   ;;  %s1336_s8 = inlined_call_operand.hbm [shape: f32[8,128], index: 8, kind: output, shape index: {}]  }
   0x1   :  { %14 = vsyncpa [#allocation6], 0 }
   0x2   :  { %15 = vsyncpa [#allocation4], 0  ;;  %s946_s27 = smov [#allocation5]   ;;  %s947_s29 = smov [#allocation2]  }
   0x3   :  { %s32_s28 = sshll.u32 %s946_s27, 4  ;;  %s22_s30 = sshll.u32 %s947_s29, 4  ;;  %s33_s28 = int_to_ptr.vmem [resolvable:$true] %s32_s28  ;;  %s23_s30 = int_to_ptr.vmem [resolvable:$true] %s22_s30 }
   0x4   :  { %s852_s11 = scalar_lea.hbm %s1329_s1, 128 }
   0x5   :  { %p853_p0 = scmp.ne.s32.totalorder %s1329_s1, %s852_s11  ;;  %p856_p1 = scmp.lt.u32.totalorder %s852_s11, %s1329_s1 }
   0x7   :  { %p858_p2 = pnand %p856_p1, %p853_p0 }
   0x9   :  { %861 = shalt.err (!%p858_p2)
}
   0xa   :  { %s862_s16 = scalar_lea.vmem %s33_s28, 128  ;;  %p867_p4 = scmp.lt.s32.totalorder %s33_s28, %s33_s28 }
   0xb   :  { %p863_p3 = scmp.ne.s32.totalorder %s33_s28, %s862_s16  ;;  %p868_p5 = scmp.lt.s32.totalorder %s862_s16, %s862_s16 }
   0xd   :  { %p869_p6 = por %p868_p5, %p867_p4 }
   0xf   :  { %p870_p7 = pnand %p869_p6, %p863_p3 }
  0x11   :  { %873 = shalt.err (!%p870_p7)
}
  0x12   :  { %35 = dma.hbm_to_vmem [thread:$0]  %s1329_s1, 128, %s33_s28, [#allocation6]  }
  0x13   :  { %s874_s21 = scalar_lea.hbm %s1328_s0, 128 }
  0x14   :  { %p875_p8 = scmp.ne.s32.totalorder %s1328_s0, %s874_s21  ;;  %p878_p9 = scmp.lt.u32.totalorder %s874_s21, %s1328_s0 }
  0x16   :  { %p880_p10 = pnand %p878_p9, %p875_p8 }
  0x18   :  { %883 = shalt.err (!%p880_p10)
}
  0x19   :  { %s884_s26 = scalar_lea.vmem %s23_s30, 128  ;;  %p889_p12 = scmp.lt.s32.totalorder %s23_s30, %s23_s30 }
  0x1a   :  { %p885_p11 = scmp.ne.s32.totalorder %s23_s30, %s884_s26  ;;  %p890_p13 = scmp.lt.s32.totalorder %s884_s26, %s884_s26 }
  0x1c   :  { %p891_p0 = por %p890_p13, %p889_p12 }
  0x1e   :  { %p892_p1 = pnand %p891_p0, %p885_p11 }
  0x20   :  { %895 = shalt.err (!%p892_p1)
}
  0x21   :  { %25 = dma.hbm_to_vmem [thread:$0]  %s1328_s0, 128, %s23_s30, [#allocation3]  }
  0x22   :  { %s948_s28 = smov [#allocation7]   ;;  %s896_s11 = scalar_lea.hbm %s1330_s2, 512 }
  0x23   :  { %s41_s29 = sshll.u32 %s948_s28, 4  ;;  %p897_p2 = scmp.ne.s32.totalorder %s1330_s2, %s896_s11  ;;  %s42_s29 = int_to_ptr.vmem [resolvable:$true] %s41_s29 }
  0x24   :  { %p900_p3 = scmp.lt.u32.totalorder %s896_s11, %s1330_s2 }
  0x26   :  { %p902_p4 = pnand %p900_p3, %p897_p2 }
  0x28   :  { %905 = shalt.err (!%p902_p4)
}
  0x29   :  { %s906_s16 = scalar_lea.vmem %s42_s29, 512  ;;  %p911_p6 = scmp.lt.s32.totalorder %s42_s29, %s42_s29 }
  0x2a   :  { %p907_p5 = scmp.ne.s32.totalorder %s42_s29, %s906_s16  ;;  %p912_p7 = scmp.lt.s32.totalorder %s906_s16, %s906_s16 }
  0x2c   :  { %p913_p8 = por %p912_p7, %p911_p6 }
  0x2e   :  { %p914_p9 = pnand %p913_p8, %p907_p5 }
  0x30   :  { %917 = shalt.err (!%p914_p9)
}
  0x31   :  { %s949_s0 = smov 128   ;;  %s950_s30 = smov 8  }
  0x32   :  { %47 = dma.hbm_to_vmem [thread:$0]  %s1330_s2, 512, %s42_s29, [#allocation6], %s949_s0, %s949_s0, %s950_s30  }
  0x33   :  { %940 = dma.done.wait [#allocation3], 128  }
  0x34   :  { %941 = vsyncadd [#allocation3], 4294967168 }
  0x35   :  { %942 = dma.done.wait [#allocation6], 640  }
  0x36   :  { %943 = vsyncadd [#allocation6], 4294966656  ;;  %v951_v0 = vmov 0.0   ;;  %vm952_vm0 = vmmov 0   ;;  %v953_v1 = vmov 0.0|0.0   ;;  %vm70_vm1 = vcmask 64512  }
  0x37   :  { %695 = vmatprep.subr.mxu0 %v951_v0  ;;  %697 = vmatprep.mubr.msk.f32.mxu0 %vm952_vm0, %v951_v0  ;;  %v68_v2 = vld [vmem:[#allocation5] sm:$0xff]  ;;  %v67_v3 = vld [vmem:[#allocation2] sm:$0xff]  ;;  %v145_v4 = vld [vmem:[#allocation7] sm:$0xff]  ;;  %vm150_vm2 = vcmask 261120   ;;  %vm234_vm3 = vcmask 523264   ;;  %s954_s29 = smov [#allocation8]  }
  0x38   :  { %749 = vmatprep.subr.bf16.mxu1 %v953_v1  ;;  %708 = vmatprep.mubr.msk.f32.mxu1 %vm952_vm0, %v951_v0  ;;  %v146_v5 = vld [vmem:[#allocation7 + $0x8] sm:$0xff]  ;;  %v147_v7 = vld [vmem:[#allocation7 + $0x10] sm:$0xff]  ;;  %v148_v8 = vld [vmem:[#allocation7 + $0x18] sm:$0xff] }
  0x39   :  { %696 = vmatpush3.msra.mxu0 %v68_v2  ;;  %v750_v6 = vpack.c.bf16 %v146_v5, %v145_v4  ;;  %v753_v9 = vpack.c.bf16 %v148_v8, %v147_v7  ;;  %v225_v10 = vld [vmem:[%s1331_s3] sm:$0xff]  ;;  %v226_v11 = vld [vmem:[%s1331_s3 + $0x8] sm:$0xff]  ;;  %v227_v12 = vld [vmem:[%s1331_s3 + $0x10] sm:$0xff] }
  0x3a   :  { %698 = vmatmul.mubr.msk.f32.vlgmr.msra.gmra.mrb[0].mxu0 %vm70_vm1, %v67_v3  ;;  %755 = vmatprep.subr.bf16.mxu0 %v953_v1  ;;  %v756_v13 = vpack.c.bf16 %v226_v11, %v225_v10  ;;  %v228_v14 = vld [vmem:[%s1331_s3 + $0x18] sm:$0xff]  ;;  %v229_v16 = vld [vmem:[%s1331_s3 + $0x20] sm:$0xff]  ;;  %v230_v17 = vld [vmem:[%s1331_s3 + $0x28] sm:$0xff] }
  0x3b   :  { %727 = vmatprep.mubr.msk.f32.mxu0 %vm952_vm0, %v951_v0  ;;  %751 = vmatpush3.bf16.msra.mxu1 %v750_v6  ;;  %v759_v15 = vpack.c.bf16 %v228_v14, %v227_v12  ;;  %v762_v18 = vpack.c.bf16 %v230_v17, %v229_v16  ;;  %v69_v19 = vld [vmem:[%s1335_s7] ss:$0 sm:$0xff]  ;;  %v231_v24 = vld [vmem:[%s1331_s3 + $0x30] sm:$0xff]  ;;  %v232_v25 = vld [vmem:[%s1331_s3 + $0x38] sm:$0xff] }
  0x3c   :  { %752 = vmatprep.subr.bf16.mxu1 %v953_v1  ;;  %757 = vmatpush3.bf16.msra.mxu0 %v756_v13  ;;  %v765_v26 = vpack.c.bf16 %v232_v25, %v231_v24  ;;  %v310_v27 = vld [vmem:[%s1332_s4 + $0x8] sm:$0xff]  ;;  %v312_v28 = vld [vmem:[%s1332_s4 + $0x18] sm:$0xff]  ;;  %v309_v29 = vld [vmem:[%s1332_s4] sm:$0xff] }
  0x3d   :  { %758 = vmatprep.subr.bf16.mxu0 %v953_v1  ;;  %v767_v30 = vpack.c.bf16 %v312_v28, %v310_v27  ;;  %v311_v31 = vld [vmem:[%s1332_s4 + $0x10] sm:$0xff]  ;;  %v314_v32 = vld [vmem:[%s1332_s4 + $0x28] sm:$0xff]  ;;  %v316_v33 = vld [vmem:[%s1332_s4 + $0x38] sm:$0xff] }
  0x3e   :  { %v769_v34 = vpack.c.bf16 %v311_v31, %v309_v29  ;;  %v771_v35 = vpack.c.bf16 %v316_v33, %v314_v32  ;;  %v313_v36 = vld [vmem:[%s1332_s4 + $0x20] sm:$0xff]  ;;  %v315_v37 = vld [vmem:[%s1332_s4 + $0x30] sm:$0xff]  ;;  %v318_v38 = vld [vmem:[%s1332_s4 + $0x48] sm:$0xff] }
  0x3f   :  { %754 = vmatpush3.bf16.msra.mxu1 %v753_v9  ;;  %v320_v39 = vld [vmem:[%s1332_s4 + $0x58] sm:$0xff]  ;;  %v773_v40 = vpack.c.bf16 %v315_v37, %v313_v36  ;;  %v317_v42 = vld [vmem:[%s1332_s4 + $0x40] sm:$0xff]  ;;  %v319_v43 = vld [vmem:[%s1332_s4 + $0x50] sm:$0xff] }
  0x40   :  { %760 = vmatpush3.bf16.msra.mxu0 %v759_v15  ;;  %768 = vmatprep.subr.bf16.mxu1 %v767_v30  ;;  %v775_v41 = vpack.c.bf16 %v320_v39, %v318_v38  ;;  %v322_v44 = vld [vmem:[%s1332_s4 + $0x68] sm:$0xff]  ;;  %v324_v45 = vld [vmem:[%s1332_s4 + $0x78] sm:$0xff]  ;;  %v777_v46 = vpack.c.bf16 %v319_v43, %v317_v42  ;;  %v321_v48 = vld [vmem:[%s1332_s4 + $0x60] sm:$0xff] }
  0x41   :  { %761 = vmatprep.subr.bf16.mxu0 %v953_v1  ;;  %v779_v47 = vpack.c.bf16 %v324_v45, %v322_v44  ;;  %v323_v49 = vld [vmem:[%s1332_s4 + $0x70] sm:$0xff]  ;;  %v326_v50 = vld [vmem:[%s1332_s4 + $0x88] sm:$0xff]  ;;  %v328_v51 = vld [vmem:[%s1332_s4 + $0x98] sm:$0xff] }
  0x42   :  { %v781_v52 = vpack.c.bf16 %v323_v49, %v321_v48  ;;  %v783_v53 = vpack.c.bf16 %v328_v51, %v326_v50  ;;  %v325_v54 = vld [vmem:[%s1332_s4 + $0x80] sm:$0xff]  ;;  %v327_v55 = vld [vmem:[%s1332_s4 + $0x90] sm:$0xff]  ;;  %v330_v56 = vld [vmem:[%s1332_s4 + $0xa8] sm:$0xff] }
  0x43   :  { %v332_v57 = vld [vmem:[%s1332_s4 + $0xb8] sm:$0xff]  ;;  %v785_v58 = vpack.c.bf16 %v327_v55, %v325_v54  ;;  %v329_v60 = vld [vmem:[%s1332_s4 + $0xa0] sm:$0xff]  ;;  %v331_v61 = vld [vmem:[%s1332_s4 + $0xb0] sm:$0xff] }
  0x44   :  { %763 = vmatpush3.bf16.msra.mxu0 %v762_v18  ;;  %v787_v59 = vpack.c.bf16 %v332_v57, %v330_v56  ;;  %v334_v62 = vld [vmem:[%s1332_s4 + $0xc8] sm:$0xff]  ;;  %v336_v63 = vld [vmem:[%s1332_s4 + $0xd8] sm:$0xff]  ;;  %v789_v2 = vpack.c.bf16 %v331_v61, %v329_v60  ;;  %v333_v4 = vld [vmem:[%s1332_s4 + $0xc0] sm:$0xff] }
  0x45   :  { %764 = vmatprep.subr.bf16.mxu0 %v953_v1  ;;  %v791_v3 = vpack.c.bf16 %v336_v63, %v334_v62  ;;  %v335_v5 = vld [vmem:[%s1332_s4 + $0xd0] sm:$0xff]  ;;  %v149_v7 = vld [vmem:[%s1335_s7 + $0x1] ss:$0 sm:$0xff]  ;;  %v338_v12 = vld [vmem:[%s1332_s4 + $0xe8] sm:$0xff] }
  0x46   :  { %v793_v6 = vpack.c.bf16 %v335_v5, %v333_v4  ;;  %v340_v13 = vld [vmem:[%s1332_s4 + $0xf8] sm:$0xff]  ;;  %v337_v15 = vld [vmem:[%s1332_s4 + $0xe0] sm:$0xff]  ;;  %v339_v16 = vld [vmem:[%s1332_s4 + $0xf0] sm:$0xff]  ;;  %s620_s4 = sshll.u32 %s954_s29, 4  ;;  %s621_s4 = int_to_ptr.vmem [resolvable:$true] %s620_s4 }
  0x47   :  { %v795_v14 = vpack.c.bf16 %v340_v13, %v338_v12  ;;  %v797_v17 = vpack.c.bf16 %v339_v16, %v337_v15  ;;  %v443_v18 = vld [vmem:[%s1333_s5 + $0x80] sm:$0xff]  ;;  %v446_v24 = vld [vmem:[%s1333_s5 + $0x98] sm:$0xff]  ;;  %v429_v27 = vld [vmem:[%s1333_s5 + $0x10] sm:$0xff]  ;;  %p923_p11 = scmp.lt.s32.totalorder %s621_s4, %s621_s4 }
  0x48   :  { %766 = vmatpush3.bf16.msra.mxu0 %v765_v26  ;;  %v430_v28 = vld [vmem:[%s1333_s5 + $0x18] sm:$0xff]  ;;  %v447_v29 = vld [vmem:[%s1333_s5 + $0xa0] sm:$0xff]  ;;  %v448_v30 = vld [vmem:[%s1333_s5 + $0xa8] sm:$0xff] }
  0x49   :  { %v805_v31 = vpack.c.bf16 %v430_v28, %v429_v27  ;;  %v807_v32 = vpack.c.bf16 %v448_v30, %v447_v29  ;;  %v431_v33 = vld [vmem:[%s1333_s5 + $0x20] sm:$0xff]  ;;  %v450_v36 = vld [vmem:[%s1333_s5 + $0xb8] sm:$0xff]  ;;  %v433_v39 = vld [vmem:[%s1333_s5 + $0x30] sm:$0xff] }
  0x4a   :  { %v452_v42 = vld [vmem:[%s1333_s5 + $0xc8] sm:$0xff]  ;;  %v435_v45 = vld [vmem:[%s1333_s5 + $0x40] sm:$0xff]  ;;  %v454_v48 = vld [vmem:[%s1333_s5 + $0xd8] sm:$0xff] }
  0x4b   :  { %v437_v51 = vld [vmem:[%s1333_s5 + $0x50] sm:$0xff]  ;;  %v456_v54 = vld [vmem:[%s1333_s5 + $0xe8] sm:$0xff]  ;;  %v233_v57 = vld [vmem:[%s1335_s7 + $0x2] ss:$0 sm:$0xff] }
  0x4c   :  { %v439_v62 = vld [vmem:[%s1333_s5 + $0x60] sm:$0xff]  ;;  %v440_v63 = vld [vmem:[%s1333_s5 + $0x68] sm:$0xff]  ;;  %v458_v4 = vld [vmem:[%s1333_s5 + $0xf8] sm:$0xff] }
  0x4d   :  { %v534_v12 = vld [vmem:[%s1334_s6 + $0x18] sm:$0xff]  ;;  %v535_v27 = vld [vmem:[%s1334_s6 + $0x20] sm:$0xff]  ;;  %v536_v28 = vld [vmem:[%s1334_s6 + $0x28] sm:$0xff] }
  0x4e   :  { %v838_v29 = vpack.c.bf16 %v536_v28, %v535_v27  ;;  %v537_v30 = vld [vmem:[%s1334_s6 + $0x30] sm:$0xff] }
 0x10d   :  { %v140_v20 = vpop.f32.mrb[0].mxu0 }
 0x10e   :  { %v141_v21 = vadd.f32 %v140_v20, %v69_v19  ;;  %v699_v22 = vpop.f32.mrb[1].mxu0  ;;  %v444_v19 = vld [vmem:[%s1333_s5 + $0x88] sm:$0xff]  ;;  %v427_v20 = vld [vmem:[%s1333_s5] sm:$0xff] }
 0x10f   :  { %v428_v22 = vld [vmem:[%s1333_s5 + $0x8] sm:$0xff] }
 0x110   :  { %v144_v23 = vmax.f32 %v141_v21, 0.0  ;;  %v799_v21 = vpack.c.bf16 %v444_v19, %v443_v18  ;;  %v801_v25 = vpack.c.bf16 %v428_v22, %v427_v20 }
 0x112   :  { %709 = vmatmul.mubr.msk.f32.vlgmr.msra.gmra.mrb[0].mxu1 %vm150_vm2, %v144_v23  ;;  %v445_v23 = vld [vmem:[%s1333_s5 + $0x90] sm:$0xff]  ;;  %800 = vmatprep.subr.bf16.mxu0 %v799_v21 }
 0x113   :  { %418 = vmatprep.mubr.f32.mxu1 %v951_v0  ;;  %770 = vmatpush1.bf16.msra.mxu1 %v769_v34  ;;  %v803_v26 = vpack.c.bf16 %v446_v24, %v445_v23  ;;  %v432_v34 = vld [vmem:[%s1333_s5 + $0x28] sm:$0xff] }
 0x114   :  { %772 = vmatprep.subr.bf16.mxu1 %v771_v35  ;;  %v449_v35 = vld [vmem:[%s1333_s5 + $0xb0] sm:$0xff]  ;;  %v809_v37 = vpack.c.bf16 %v432_v34, %v431_v33  ;;  %v459_v34 = vld [vmem:[%s1335_s7 + $0x4] ss:$0 sm:$0xff] }
 0x115   :  { %v811_v38 = vpack.c.bf16 %v450_v36, %v449_v35 }
 0x117   :  { %774 = vmatpush1.bf16.msra.mxu1 %v773_v40  ;;  %v434_v40 = vld [vmem:[%s1333_s5 + $0x38] sm:$0xff] }
 0x118   :  { %776 = vmatprep.subr.bf16.mxu1 %v775_v41  ;;  %v451_v41 = vld [vmem:[%s1333_s5 + $0xc0] sm:$0xff]  ;;  %v813_v43 = vpack.c.bf16 %v434_v40, %v433_v39 }
 0x119   :  { %v815_v44 = vpack.c.bf16 %v452_v42, %v451_v41 }
 0x11b   :  { %778 = vmatpush1.bf16.msra.mxu1 %v777_v46  ;;  %v436_v46 = vld [vmem:[%s1333_s5 + $0x48] sm:$0xff] }
 0x11c   :  { %780 = vmatprep.subr.bf16.mxu1 %v779_v47  ;;  %v453_v47 = vld [vmem:[%s1333_s5 + $0xd0] sm:$0xff]  ;;  %v817_v49 = vpack.c.bf16 %v436_v46, %v435_v45 }
 0x11d   :  { %v819_v50 = vpack.c.bf16 %v454_v48, %v453_v47 }
 0x11f   :  { %782 = vmatpush1.bf16.msra.mxu1 %v781_v52  ;;  %v438_v52 = vld [vmem:[%s1333_s5 + $0x58] sm:$0xff] }
 0x120   :  { %784 = vmatprep.subr.bf16.mxu1 %v783_v53  ;;  %v455_v53 = vld [vmem:[%s1333_s5 + $0xe0] sm:$0xff]  ;;  %v821_v55 = vpack.c.bf16 %v438_v52, %v437_v51 }
 0x121   :  { %v823_v56 = vpack.c.bf16 %v456_v54, %v455_v53 }
 0x123   :  { %786 = vmatpush1.bf16.msra.mxu1 %v785_v58 }
 0x124   :  { %788 = vmatprep.subr.bf16.mxu1 %v787_v59 }
 0x127   :  { %790 = vmatpush1.bf16.msra.mxu1 %v789_v2  ;;  %v825_v2 = vpack.c.bf16 %v440_v63, %v439_v62 }
 0x128   :  { %792 = vmatprep.subr.bf16.mxu1 %v791_v3  ;;  %v457_v3 = vld [vmem:[%s1333_s5 + $0xf0] sm:$0xff] }
 0x129   :  { %v827_v5 = vpack.c.bf16 %v458_v4, %v457_v3 }
 0x12b   :  { %794 = vmatpush1.bf16.msra.mxu1 %v793_v6  ;;  %v442_v6 = vld [vmem:[%s1333_s5 + $0x78] sm:$0xff] }
 0x12c   :  { %796 = vmatprep.subr.bf16.mxu1 %v795_v14  ;;  %v344_v14 = vlaneseq }
 0x12e   :  { %v345_v15 = vshrl.u32 %v344_v14, 7 }
 0x12f   :  { %798 = vmatpush1.bf16.msra.mxu1 %v797_v17  ;;  %v633_v17 = vld [vmem:[%s1335_s7 + $0x3] ss:$8 sm:$0x3] }
 0x130   :  { %831 = vmatprep.subr.bf16.mxu1 %v953_v1  ;;  %v346_v16 = vsub.s32 0, %v345_v15  ;;  %v350_v18 = vsub.s32 1, %v345_v15 }
 0x132   :  { %v347_v19 = vrot.slane %v633_v17, %v346_v16  ;;  %v351_v20 = vrot.slane %v633_v17, %v350_v18 }
 0x1e5   :  { %v220_v8 = vpop.f32.mrb[0].mxu1 }
 0x1e6   :  { %v221_v9 = vadd.f32 %v220_v8, %v149_v7  ;;  %v710_v10 = vpop.f32.mrb[1].mxu1  ;;  %v531_v8 = vld [vmem:[%s1334_s6] sm:$0xff] }
 0x1e7   :  { %v533_v10 = vld [vmem:[%s1334_s6 + $0x10] sm:$0xff] }
 0x1e8   :  { %v224_v11 = vmax.f32 %v221_v9, 0.0  ;;  %v532_v9 = vld [vmem:[%s1334_s6 + $0x8] sm:$0xff]  ;;  %v835_v13 = vpack.c.bf16 %v534_v12, %v533_v10 }
 0x1ea   :  { %728 = vmatmul.mubr.msk.f32.vlgmr.msra.gmra.mrb[2].mxu0 %vm234_vm3, %v224_v11  ;;  %v832_v11 = vpack.c.bf16 %v532_v9, %v531_v8 }
 0x1eb   :  { %802 = vmatpush3.bf16.msra.mxu0 %v801_v25 }
 0x1ec   :  { %804 = vmatprep.subr.bf16.mxu0 %v803_v26 }
 0x1ef   :  { %806 = vmatpush3.bf16.msra.mxu0 %v805_v31  ;;  %v538_v31 = vld [vmem:[%s1334_s6 + $0x38] sm:$0xff]  ;;  %s918_s6 = scalar_lea.vmem %s621_s4, 128 }
 0x1f0   :  { %808 = vmatprep.subr.bf16.mxu0 %v807_v32  ;;  %v841_v32 = vpack.c.bf16 %v538_v31, %v537_v30  ;;  %p919_p10 = scmp.ne.s32.totalorder %s621_s4, %s918_s6  ;;  %p924_p12 = scmp.lt.s32.totalorder %s918_s6, %s918_s6 }
 0x1f2   :  { %p925_p13 = por %p924_p12, %p923_p11 }
 0x1f3   :  { %810 = vmatpush3.bf16.msra.mxu0 %v809_v37 }
 0x1f4   :  { %812 = vmatprep.subr.bf16.mxu0 %v811_v38  ;;  %p926_p0 = pnand %p925_p13, %p919_p10 }
 0x1f7   :  { %814 = vmatpush3.bf16.msra.mxu0 %v813_v43 }
 0x1f8   :  { %816 = vmatprep.subr.bf16.mxu0 %v815_v44 }
 0x1fb   :  { %818 = vmatpush3.bf16.msra.mxu0 %v817_v49 }
 0x1fc   :  { %820 = vmatprep.subr.bf16.mxu0 %v819_v50 }
 0x1ff   :  { %822 = vmatpush3.bf16.msra.mxu0 %v821_v55 }
 0x200   :  { %824 = vmatprep.subr.bf16.mxu0 %v823_v56 }
 0x203   :  { %826 = vmatpush3.bf16.msra.mxu0 %v825_v2 }
 0x204   :  { %828 = vmatprep.subr.bf16.mxu0 %v827_v5 }
 0x2bd   :  { %v304_v58 = vpop.f32.mrb[2].mxu0 }
 0x2be   :  { %v305_v59 = vadd.f32 %v304_v58, %v233_v57  ;;  %v729_v60 = vpop.f32.mrb[3].mxu0 }
 0x2c0   :  { %v308_v61 = vmax.f32 %v305_v59, 0.0 }
 0x2c2   :  { %419 = vmatmul.mubr.f32.vlgmr.msra.gmra.mrb[2].mxu1 %v308_v61 }
 0x2c3   :  { %746 = vmatprep.mubr.msk.f32.mxu1 %vm952_vm0, %v951_v0  ;;  %v441_v0 = vld [vmem:[%s1333_s5 + $0x70] sm:$0xff]  ;;  %833 = vmatpush3.bf16.msra.mxu1 %v832_v11 }
 0x2c4   :  { %v829_v7 = vpack.c.bf16 %v442_v6, %v441_v0  ;;  %834 = vmatprep.subr.bf16.mxu1 %v953_v1 }
 0x2c6   :  { %830 = vmatpush3.bf16.msra.mxu0 %v829_v7 }
 0x2c7   :  { %836 = vmatpush3.bf16.msra.mxu1 %v835_v13 }
 0x2c8   :  { %837 = vmatprep.subr.bf16.mxu1 %v953_v1 }
 0x2cb   :  { %839 = vmatpush3.bf16.msra.mxu1 %v838_v29 }
 0x2cc   :  { %840 = vmatprep.subr.bf16.mxu1 %v953_v1  ;;  %v539_v1 = vld [vmem:[%s1335_s7 + $0x5] ss:$0 sm:$0xff] }
 0x2cf   :  { %842 = vmatpush3.bf16.msra.mxu1 %v841_v32 }
 0x395   :  { %v420_v21 = vpop.f32.mrb[2].mxu1 }
 0x396   :  { %v421_v22 = vadd.f32 %v420_v21, %v347_v19  ;;  %v422_v23 = vpop.f32.mrb[3].mxu1 }
 0x397   :  { %v423_v24 = vadd.f32 %v422_v23, %v351_v20 }
 0x398   :  { %v425_v26 = vmax.f32 %v421_v22, 0.0 }
 0x399   :  { %v426_v25 = vmax.f32 %v423_v24, 0.0 }
 0x39b   :  { %524 = vmatprep.mubr.f32.mxu0 %v426_v25 }
 0x39c   :  { %525 = vmatmul.mubr.f32.vlgmr.msra.gmra.mrb[4].mxu0 %v425_v26 }
 0x46f   :  { %v683_v33 = vpop.f32.mrb[4].mxu0 }
 0x470   :  { %v684_v35 = vpop.f32.mrb[5].mxu0 }
 0x471   :  { %v685_v36 = vadd.f32 %v684_v35, %v683_v33 }
 0x473   :  { %v527_v37 = vadd.f32 %v685_v36, %v459_v34 }
 0x475   :  { %v530_v38 = vmax.f32 %v527_v37, 0.0 }
 0x477   :  { %747 = vmatmul.mubr.msk.f32.vlgmr.msra.gmra.mrb[4].mxu1 %vm234_vm3, %v530_v38 }
 0x54a   :  { %v609_v39 = vpop.f32.mrb[4].mxu1 }
 0x54b   :  { %v610_v40 = vadd.f32 %v609_v39, %v539_v1  ;;  %v748_v41 = vpop.f32.mrb[5].mxu1 }
 0x54d   :  { %613 = vst [vmem:[#allocation8] sm:$0xff] %v610_v40 }
 0x54e   :  { %929 = shalt.err (!%p926_p0)
}
 0x54f   :  { %s930_s11 = scalar_lea.hbm %s1336_s8, 128 }
 0x550   :  { %p931_p1 = scmp.ne.s32.totalorder %s1336_s8, %s930_s11  ;;  %p934_p2 = scmp.lt.u32.totalorder %s930_s11, %s1336_s8 }
 0x552   :  { %p936_p3 = pnand %p934_p2, %p931_p1 }
 0x554   :  { %939 = shalt.err (!%p936_p3)
}
 0x555   :  { %623 = dma.vmem_to_hbm [thread:$0]  %s621_s4, 128, %s1336_s8, [#allocation4]  }
 0x556   :  { %944 = dma.done.wait [#allocation4], 128  }
 0x557   :  { %945 = vsyncadd [#allocation4], 4294967168 }
 0x558   :  { %627 = vsyncpa [#allocation3], 1 }
 0x559   :  { %628 = vsyncpa [#allocation6], 1 }
 0x55a   :  { %629 = vsyncpa [#allocation4], 1 }

</bundles_post_ra>
